<compile_context>
chip_gen: v6e
topology: v6e:2x2x1
jax: 0.10.0
libtpu: 0.0.40
codegen_flags: <defaults>
</compile_context>

<pallas_src>
import jax
import jax.numpy as jnp
from jax.experimental import pallas as pl
from jax.experimental.pallas import tpu as pltpu

BN_EPS = 1e-5


def brawlstars_mlp_kernel(
    x_ref,            # (tile_b, input_size)  bf16
    w1_ref, b1_ref,   # (input_size, 128), (1, 128)   BN1 folded in
    w2_ref, b2_ref,   # (128, 64),        (1, 64)     BN2 folded in
    w3_ref, b3_ref,   # (1, 64),          (1, 1)
    o_ref,            # (tile_b, 1)  f32
):
    # x travels HBM->VMEM in bf16; compute in f32 (MXU accumulates in f32).
    x = x_ref[...].astype(jnp.float32)

    # fc1 (+ folded bn1) -> relu.   dropout(p=0.5) is identity in eval mode.
    h = jnp.dot(x, w1_ref[...], preferred_element_type=jnp.float32) + b1_ref[...]
    h = jnp.maximum(h, 0.0)

    # fc2 (+ folded bn2) -> relu.
    h = jnp.dot(h, w2_ref[...], preferred_element_type=jnp.float32) + b2_ref[...]
    h = jnp.maximum(h, 0.0)

    # fc3 (64 -> 1): VPU elementwise mul + XLU lane reduction (no MXU pass).
    out = jnp.sum(h * w3_ref[...], axis=-1, keepdims=True) + b3_ref[...]
    o_ref[...] = out.astype(o_ref.dtype)


def _round_up(n, m):
    return (n + m - 1) // m * m


def fold_bn_into_linear(params):
    """One-time constant folding of eval-mode BatchNorm1d into the Linears.

    y = (Wx + b - mean) * gamma/sqrt(var+eps) + beta
      = x @ (W * s) + ((b - mean) * s + beta),   s = gamma/sqrt(var+eps)
    """
    (w1, b1, g1, be1, m1, v1,
     w2, b2, g2, be2, m2, v2,
     w3, b3) = params
    s1 = g1 / jnp.sqrt(v1 + BN_EPS)          # (1, 128)
    s2 = g2 / jnp.sqrt(v2 + BN_EPS)          # (1, 64)
    w1f = w1 * s1                            # scale output columns
    b1f = (b1 - m1) * s1 + be1
    w2f = w2 * s2
    b2f = (b2 - m2) * s2 + be2
    w3_row = w3.T                            # (1, 64) row for the VPU path
    b3f = b3.reshape(1, 1)
    return w1f, b1f, w2f, b2f, w3_row, b3f


def brawlstars_nn_forward(x, params, *, tile_b=1024, x_dtype=jnp.bfloat16):
    """x: (B, input_size) float32.  Returns (B, 1) float32.

    tile_b: max batch tile (multiple of 8).  The effective tile shrinks for
    small batches (pad only to a multiple of 8) and is capped so the
    double-buffered x tile stays ~<= 8 MiB of VMEM.
    """
    B, input_size = x.shape
    assert tile_b % 8 == 0, "tile_b must be a multiple of 8"

    w1f, b1f, w2f, b2f, w3_row, b3f = fold_bn_into_linear(params)
    H1 = w1f.shape[1]   # 128
    H2 = w2f.shape[1]   # 64
    OUT = 1

    # Effective tile: big enough to amortize the ~0.35us/step grid overhead,
    # small enough to (a) not over-pad tiny batches, (b) not blow scoped VMEM.
    bytes_per_row = input_size * jnp.dtype(x_dtype).itemsize
    vmem_cap_rows = max(8, ((8 << 20) // (2 * bytes_per_row)) // 8 * 8)
    tb = max(8, min(tile_b, vmem_cap_rows, _round_up(B, 8)))
    B_pad = _round_up(B, tb)

    x = x.astype(x_dtype)
    if B_pad != B:
        x = jnp.pad(x, ((0, B_pad - B), (0, 0)))

    def rep(shape):
        # Parameter replicated across the batch grid: constant block index,
        # so the pipeline DMAs it once and reuses the VMEM buffer afterwards.
        return pl.BlockSpec(shape, lambda i: (0, 0))

    out = pl.pallas_call(
        brawlstars_mlp_kernel,
        out_shape=jax.ShapeDtypeStruct((B_pad, OUT), jnp.float32),
        grid_spec=pltpu.PrefetchScalarGridSpec(
            num_scalar_prefetch=0,
            grid=(B_pad // tb,),
            in_specs=[
                pl.BlockSpec((tb, input_size), lambda i: (i, 0)),   # x tiles
                rep((input_size, H1)), rep((1, H1)),                # w1', b1'
                rep((H1, H2)), rep((1, H2)),                        # w2', b2'
                rep((1, H2)), rep((1, 1)),                          # w3 row, b3
            ],
            out_specs=pl.BlockSpec((tb, OUT), lambda i: (i, 0)),
        ),
        compiler_params=pltpu.CompilerParams(
            dimension_semantics=("parallel",),   # v7x: shard batch across TCs
        ),
    )(x, w1f, b1f, w2f, b2f, w3_row, b3f)

    return out[:B]


def init_params(key, input_size):
    """Deterministic params mimicking PyTorch defaults (eval-mode BN stats)."""
    ks = jax.random.split(key, 6)

    def linear(kw, kb, fan_in, fan_out):
        bound = 1.0 / jnp.sqrt(float(fan_in))
        w = jax.random.uniform(kw, (fan_in, fan_out), jnp.float32, -bound, bound)
        b = jax.random.uniform(kb, (1, fan_out), jnp.float32, -bound, bound)
        return w, b

    w1, b1 = linear(ks[0], ks[1], input_size, 128)
    w2, b2 = linear(ks[2], ks[3], 128, 64)
    w3, b3 = linear(ks[4], ks[5], 64, 1)

    def bn(n):
        return (jnp.ones((1, n), jnp.float32),   # gamma
                jnp.zeros((1, n), jnp.float32),  # beta
                jnp.zeros((1, n), jnp.float32),  # running_mean
                jnp.ones((1, n), jnp.float32))   # running_var

    g1, be1, m1, v1 = bn(128)
    g2, be2, m2, v2 = bn(64)

    return (w1, b1, g1, be1, m1, v1,
            w2, b2, g2, be2, m2, v2,
            w3, b3)


def reference_forward(x, params):
    """Pure-JAX reference using the UNfolded BN formula (checks folding too)."""
    (w1, b1, g1, be1, m1, v1,
     w2, b2, g2, be2, m2, v2,
     w3, b3) = params
    h = x @ w1 + b1
    h = jnp.maximum((h - m1) * (g1 / jnp.sqrt(v1 + BN_EPS)) + be1, 0.0)
    h = h @ w2 + b2
    h = jnp.maximum((h - m2) * (g2 / jnp.sqrt(v2 + BN_EPS)) + be2, 0.0)
    return h @ w3 + b3


if __name__ == "__main__":
    INPUT_SIZE = 32
    BATCH = 16

    key = jax.random.PRNGKey(0)
    k_x, k_p = jax.random.split(key)

    x = jax.random.normal(k_x, (BATCH, INPUT_SIZE), jnp.float32)
    params = init_params(k_p, INPUT_SIZE)

    fwd = jax.jit(brawlstars_nn_forward)   # fuse BN folding / padding with the call
    out = fwd(x, params)
    out = jax.block_until_ready(out)

    # Reference sees the same bf16 quantization of x as the kernel's HBM path;
    # everything downstream is f32 on both sides.
    x_q = x.astype(jnp.bfloat16).astype(jnp.float32)
    ref = reference_forward(x_q, params)

    assert out.shape == (BATCH, 1), out.shape
    assert jnp.allclose(out, ref, atol=1e-4, rtol=1e-4), (
        f"max abs err {jnp.max(jnp.abs(out - ref))}"
    )

    print("KERNEL_OK")
</pallas_src>

<mosaic_0001>
module attributes {stable_mosaic.version = 11 : i64} {
  func.func @brawlstars_mlp_kernel(%arg0: i32, %arg1: memref<16x32xbf16, #tpu.memory_space<vmem>>, %arg2: memref<32x128xf32, #tpu.memory_space<vmem>>, %arg3: memref<1x128xf32, #tpu.memory_space<vmem>>, %arg4: memref<128x64xf32, #tpu.memory_space<vmem>>, %arg5: memref<1x64xf32, #tpu.memory_space<vmem>>, %arg6: memref<1x64xf32, #tpu.memory_space<vmem>>, %arg7: memref<1x1xf32, #tpu.memory_space<vmem>>, %arg8: memref<16x1xf32, #tpu.memory_space<vmem>>) attributes {dimension_semantics = [#tpu.dimension_semantics<parallel>], iteration_bounds = array<i64: 1>, scalar_prefetch = 0 : i64, scratch_operands = 0 : i64, tpu.core_type = #tpu.core_type<tc>, window_params = [{transform_indices = @transform_0, window_bounds = array<i64: 16, 32>}, {pipeline_mode = #tpu.pipeline_mode<synchronous>, transform_indices = @transform_1, window_bounds = array<i64: 32, 128>}, {pipeline_mode = #tpu.pipeline_mode<synchronous>, transform_indices = @transform_2, window_bounds = array<i64: 1, 128>}, {pipeline_mode = #tpu.pipeline_mode<synchronous>, transform_indices = @transform_3, window_bounds = array<i64: 128, 64>}, {pipeline_mode = #tpu.pipeline_mode<synchronous>, transform_indices = @transform_4, window_bounds = array<i64: 1, 64>}, {pipeline_mode = #tpu.pipeline_mode<synchronous>, transform_indices = @transform_5, window_bounds = array<i64: 1, 64>}, {pipeline_mode = #tpu.pipeline_mode<synchronous>, transform_indices = @transform_6, window_bounds = array<i64: 1, 1>}, {transform_indices = @transform_7, window_bounds = array<i64: 16, 1>}]} {
    %c0 = arith.constant 0 : index
    %c0_0 = arith.constant 0 : index
    %0 = vector.load %arg1[%c0, %c0_0] : memref<16x32xbf16, #tpu.memory_space<vmem>>, vector<16x32xbf16>
    %1 = arith.extf %0 : vector<16x32xbf16> to vector<16x32xf32>
    %c0_1 = arith.constant 0 : index
    %c0_2 = arith.constant 0 : index
    %2 = vector.load %arg2[%c0_1, %c0_2] : memref<32x128xf32, #tpu.memory_space<vmem>>, vector<32x128xf32>
    %cst = arith.constant dense<0.000000e+00> : vector<16x128xf32>
    %3 = tpu.matmul %1, %2, %cst {dimension_numbers = #tpu.dot_dimension_numbers<[1], [0], [0], [1], [0, 0, 1, 1], [], []>} : vector<16x32xf32>, vector<32x128xf32>, vector<16x128xf32> -> vector<16x128xf32>
    %c0_3 = arith.constant 0 : index
    %c0_4 = arith.constant 0 : index
    %4 = vector.load %arg3[%c0_3, %c0_4] : memref<1x128xf32, #tpu.memory_space<vmem>>, vector<1x128xf32>
    %5 = vector.broadcast %4 : vector<1x128xf32> to vector<16x128xf32>
    %6 = arith.addf %3, %5 : vector<16x128xf32>
    %cst_5 = arith.constant 0.000000e+00 : f32
    %7 = vector.broadcast %cst_5 : f32 to vector<16x128xf32>
    %8 = arith.maximumf %6, %7 : vector<16x128xf32>
    %c0_6 = arith.constant 0 : index
    %c0_7 = arith.constant 0 : index
    %9 = vector.load %arg4[%c0_6, %c0_7] : memref<128x64xf32, #tpu.memory_space<vmem>>, vector<128x64xf32>
    %cst_8 = arith.constant dense<0.000000e+00> : vector<16x64xf32>
    %10 = tpu.matmul %8, %9, %cst_8 {dimension_numbers = #tpu.dot_dimension_numbers<[1], [0], [0], [1], [0, 0, 1, 1], [], []>} : vector<16x128xf32>, vector<128x64xf32>, vector<16x64xf32> -> vector<16x64xf32>
    %c0_9 = arith.constant 0 : index
    %c0_10 = arith.constant 0 : index
    %11 = vector.load %arg5[%c0_9, %c0_10] : memref<1x64xf32, #tpu.memory_space<vmem>>, vector<1x64xf32>
    %12 = vector.broadcast %11 : vector<1x64xf32> to vector<16x64xf32>
    %13 = arith.addf %10, %12 : vector<16x64xf32>
    %cst_11 = arith.constant 0.000000e+00 : f32
    %14 = vector.broadcast %cst_11 : f32 to vector<16x64xf32>
    %15 = arith.maximumf %13, %14 : vector<16x64xf32>
    %c0_12 = arith.constant 0 : index
    %c0_13 = arith.constant 0 : index
    %16 = vector.load %arg6[%c0_12, %c0_13] : memref<1x64xf32, #tpu.memory_space<vmem>>, vector<1x64xf32>
    %17 = vector.broadcast %16 : vector<1x64xf32> to vector<16x64xf32>
    %18 = arith.mulf %15, %17 : vector<16x64xf32>
    %cst_14 = arith.constant dense<0.000000e+00> : vector<16xf32>
    %19 = vector.multi_reduction <add>, %18, %cst_14 [1] : vector<16x64xf32> to vector<16xf32>
    %20 = vector.shape_cast %19 : vector<16xf32> to vector<16x1xf32>
    %c0_15 = arith.constant 0 : index
    %c0_16 = arith.constant 0 : index
    %21 = vector.load %arg7[%c0_15, %c0_16] : memref<1x1xf32, #tpu.memory_space<vmem>>, vector<1x1xf32>
    %22 = vector.broadcast %21 : vector<1x1xf32> to vector<16x1xf32>
    %23 = arith.addf %20, %22 : vector<16x1xf32>
    %c0_17 = arith.constant 0 : index
    %c0_18 = arith.constant 0 : index
    %24 = vector.load %arg8[%c0_17, %c0_18] : memref<16x1xf32, #tpu.memory_space<vmem>>, vector<16x1xf32>
    tpu.vector_store %arg8[%c0_17, %c0_18], %23 {strides = array<i32>} : memref<16x1xf32, #tpu.memory_space<vmem>>, vector<16x1xf32>,
    return
  }
  func.func @transform_0(%arg0: i32) -> (i32, i32) {
    %c0_i32 = arith.constant 0 : i32
    %c0_i32_0 = arith.constant 0 : i32
    return %arg0, %c0_i32 : i32, i32
  }
  func.func @transform_1(%arg0: i32) -> (i32, i32) {
    %c0_i32 = arith.constant 0 : i32
    %c0_i32_0 = arith.constant 0 : i32
    %c0_i32_1 = arith.constant 0 : i32
    return %c0_i32, %c0_i32_0 : i32, i32
  }
  func.func @transform_2(%arg0: i32) -> (i32, i32) {
    %c0_i32 = arith.constant 0 : i32
    %c0_i32_0 = arith.constant 0 : i32
    %c0_i32_1 = arith.constant 0 : i32
    return %c0_i32, %c0_i32_0 : i32, i32
  }
  func.func @transform_3(%arg0: i32) -> (i32, i32) {
    %c0_i32 = arith.constant 0 : i32
    %c0_i32_0 = arith.constant 0 : i32
    %c0_i32_1 = arith.constant 0 : i32
    return %c0_i32, %c0_i32_0 : i32, i32
  }
  func.func @transform_4(%arg0: i32) -> (i32, i32) {
    %c0_i32 = arith.constant 0 : i32
    %c0_i32_0 = arith.constant 0 : i32
    %c0_i32_1 = arith.constant 0 : i32
    return %c0_i32, %c0_i32_0 : i32, i32
  }
  func.func @transform_5(%arg0: i32) -> (i32, i32) {
    %c0_i32 = arith.constant 0 : i32
    %c0_i32_0 = arith.constant 0 : i32
    %c0_i32_1 = arith.constant 0 : i32
    return %c0_i32, %c0_i32_0 : i32, i32
  }
  func.func @transform_6(%arg0: i32) -> (i32, i32) {
    %c0_i32 = arith.constant 0 : i32
    %c0_i32_0 = arith.constant 0 : i32
    %c0_i32_1 = arith.constant 0 : i32
    return %c0_i32, %c0_i32_0 : i32, i32
  }
  func.func @transform_7(%arg0: i32) -> (i32, i32) {
    %c0_i32 = arith.constant 0 : i32
    %c0_i32_0 = arith.constant 0 : i32
    return %arg0, %c0_i32 : i32, i32
  }
}

</mosaic_0001>

<bundles_post_ra>
// kernel: brawlstars_nn_forward.1
= control target key start
LH: loop header
LB: loop body
LE: loop exit
PB: predicated region body
PF: predicated region fallthrough
CT: control target
= control target key end

     0   :  { %vm43_vm0 = vcmask 261120   ;;  %vm236_vm1 = vcmask 523264   ;;  %vm252_vm2 = vcmask 7168   ;;  %s462_s1 = inlined_call_operand.vmem [shape: f32[32,128], index: 1, kind: input, shape index: {}]   ;;  %s463_s0 = inlined_call_operand.vmem [shape: bf16[16,32], index: 0, kind: input, shape index: {}]   ;;  %s464_s3 = inlined_call_operand.vmem [shape: f32[128,64], index: 3, kind: input, shape index: {}]   ;;  %s465_s2 = inlined_call_operand.vmem [shape: f32[1,128], index: 2, kind: input, shape index: {}]   ;;  %s466_s6 = inlined_call_operand.<no memory space> [shape: f32[1,1], index: 6, kind: input, shape index: {}]   ;;  %s467_s4 = inlined_call_operand.vmem [shape: f32[1,64], index: 4, kind: input, shape index: {}]   ;;  %s468_s5 = inlined_call_operand.vmem [shape: f32[1,64], index: 5, kind: input, shape index: {}]   ;;  %s469_s7 = inlined_call_operand.vmem [shape: f32[16,1], index: 7, kind: output, shape index: {}]  }
   0x1   :  { %v35_v0 = vld [vmem:[%s462_s1 + $0x18] sm:$0xff]  ;;  %v34_v1 = vld [vmem:[%s462_s1 + $0x10] sm:$0xff]  ;;  %v266_v2 = vld [vmem:[%s463_s0] sm:$0xff]   ;;  %v12_v30 = vstv %s466_s6 }
   0x2   :  { %293 = vmatprep.subr.mxu0 %v35_v0  ;;  %v142_v3 = vld [vmem:[%s464_s3 + $0x78] sm:$0xff]  ;;  %v33_v4 = vld [vmem:[%s462_s1 + $0x8] sm:$0xff]  ;;  %v267_v5 = vunpack.c.l.bf16 %v266_v2  ;;  %v141_v6 = vld [vmem:[%s464_s3 + $0x70] sm:$0xff]  ;;  %v268_v9 = vunpack.c.h.bf16 %v266_v2  ;;  %13 = vst [vmem:[#allocation2] sm:$0x1] %v12_v30 }
   0x3   :  { %294 = vmatpush3.msra.mxu0 %v35_v0  ;;  %304 = vmatprep.subr.mxu1 %v142_v3  ;;  %v32_v7 = vld [vmem:[%s462_s1] sm:$0xff]  ;;  %v140_v8 = vld [vmem:[%s464_s3 + $0x68] sm:$0xff]  ;;  %v138_v11 = vld [vmem:[%s464_s3 + $0x58] sm:$0xff] }
   0x4   :  { %295 = vmatprep.subr.mxu0 %v34_v1  ;;  %305 = vmatpush3.msra.mxu1 %v142_v3  ;;  %v139_v10 = vld [vmem:[%s464_s3 + $0x60] sm:$0xff]  ;;  %v137_v12 = vld [vmem:[%s464_s3 + $0x50] sm:$0xff]  ;;  %v136_v13 = vld [vmem:[%s464_s3 + $0x48] sm:$0xff] }
   0x5   :  { %296 = vmatpush3.msra.mxu0 %v34_v1  ;;  %301 = vmatprep.mubr.msk.f32.mxu0 %vm43_vm0, %v267_v5  ;;  %v135_v14 = vld [vmem:[%s464_s3 + $0x40] sm:$0xff]  ;;  %v134_v15 = vld [vmem:[%s464_s3 + $0x38] sm:$0xff]  ;;  %v133_v16 = vld [vmem:[%s464_s3 + $0x30] sm:$0xff] }
   0x6   :  { %297 = vmatprep.subr.mxu0 %v33_v4  ;;  %306 = vmatprep.subr.mxu1 %v141_v6  ;;  %v132_v17 = vld [vmem:[%s464_s3 + $0x28] sm:$0xff]  ;;  %v131_v18 = vld [vmem:[%s464_s3 + $0x20] sm:$0xff]  ;;  %v130_v19 = vld [vmem:[%s464_s3 + $0x18] sm:$0xff] }
   0x7   :  { %298 = vmatpush3.msra.mxu0 %v33_v4  ;;  %307 = vmatpush3.msra.mxu1 %v141_v6  ;;  %v129_v20 = vld [vmem:[%s464_s3 + $0x10] sm:$0xff]  ;;  %v128_v21 = vld [vmem:[%s464_s3 + $0x8] sm:$0xff]  ;;  %v127_v22 = vld [vmem:[%s464_s3] sm:$0xff] }
   0x8   :  { %299 = vmatprep.subr.mxu0 %v32_v7  ;;  %308 = vmatprep.subr.mxu1 %v140_v8  ;;  %v259_v23 = vld [vmem:[%s465_s2] ss:$0 sm:$0xff] }
   0x9   :  { %300 = vmatpush3.msra.mxu0 %v32_v7  ;;  %309 = vmatpush3.msra.mxu1 %v140_v8  ;;  %v262_v31 = vld [vmem:[%s467_s4] ss:$0 sm:$0xff] }
   0xa   :  { %302 = vmatmul.mubr.msk.f32.vlgmr.msra.gmra.mxu0 %vm43_vm0, %v268_v9  ;;  %310 = vmatprep.subr.mxu1 %v139_v10  ;;  %v263_v38 = vld [vmem:[%s468_s5] ss:$0 sm:$0xff] }
   0xb   :  { %311 = vmatpush3.msra.mxu1 %v139_v10  ;;  %v264_v43 = vld [vmem:[#allocation2] ss:$0 sm:$0xff] }
   0xc   :  { %312 = vmatprep.subr.mxu1 %v138_v11 }
   0xd   :  { %313 = vmatpush3.msra.mxu1 %v138_v11 }
   0xe   :  { %314 = vmatprep.subr.mxu1 %v137_v12 }
   0xf   :  { %315 = vmatpush3.msra.mxu1 %v137_v12 }
  0x10   :  { %316 = vmatprep.subr.mxu1 %v136_v13 }
  0x11   :  { %317 = vmatpush3.msra.mxu1 %v136_v13 }
  0x12   :  { %318 = vmatprep.subr.mxu1 %v135_v14 }
  0x13   :  { %319 = vmatpush3.msra.mxu1 %v135_v14 }
  0x14   :  { %320 = vmatprep.subr.mxu1 %v134_v15 }
  0x15   :  { %321 = vmatpush3.msra.mxu1 %v134_v15 }
  0x16   :  { %322 = vmatprep.subr.mxu1 %v133_v16 }
  0x17   :  { %323 = vmatpush3.msra.mxu1 %v133_v16 }
  0x18   :  { %324 = vmatprep.subr.mxu1 %v132_v17 }
  0x19   :  { %325 = vmatpush3.msra.mxu1 %v132_v17 }
  0x1a   :  { %326 = vmatprep.subr.mxu1 %v131_v18 }
  0x1b   :  { %327 = vmatpush3.msra.mxu1 %v131_v18 }
  0x1c   :  { %328 = vmatprep.subr.mxu1 %v130_v19 }
  0x1d   :  { %329 = vmatpush3.msra.mxu1 %v130_v19 }
  0x1e   :  { %330 = vmatprep.subr.mxu1 %v129_v20 }
  0x1f   :  { %331 = vmatpush3.msra.mxu1 %v129_v20 }
  0x20   :  { %332 = vmatprep.subr.mxu1 %v128_v21 }
  0x21   :  { %333 = vmatpush3.msra.mxu1 %v128_v21 }
  0x22   :  { %334 = vmatprep.subr.mxu1 %v127_v22 }
  0x23   :  { %335 = vmatpush3.msra.mxu1 %v127_v22 }
  0xca   :  { %v303_v24 = vpop.f32.mrf.mxu0 }
  0xcb   :  { %v122_v25 = vadd.f32 %v303_v24, %v259_v23 }
  0xcc   :  { %v116_v26 = vpop.f32.mrf.mxu0 }
  0xcd   :  { %v117_v27 = vadd.f32 %v259_v23, %v116_v26  ;;  %v126_v29 = vmax.f32 %v122_v25, 0.0 }
  0xcf   :  { %v125_v28 = vmax.f32 %v117_v27, 0.0 }
  0xd1   :  { %336 = vmatprep.mubr.f32.mxu1 %v125_v28 }
  0xd2   :  { %337 = vmatmul.mubr.f32.vlgmr.msra.gmra.mxu1 %v126_v29 }
 0x192   :  { %v338_v32 = vpop.f32.mrf.mxu1 }
 0x193   :  { %v222_v33 = vadd.f32 %v338_v32, %v262_v31 }
 0x194   :  { %v216_v34 = vpop.f32.mrf.mxu1 }
 0x195   :  { %v217_v35 = vadd.f32 %v262_v31, %v216_v34  ;;  %v226_v36 = vmax.f32 %v222_v33, 0.0 }
 0x197   :  { %v225_v37 = vmax.f32 %v217_v35, 0.0  ;;  %v235_v41 = vmul.f32 %v263_v38, %v226_v36 }
 0x199   :  { %v234_v39 = vmul.f32 %v263_v38, %v225_v37  ;;  %v240_v42 = vsel %vm236_vm1, %v235_v41, 0.0 }
 0x19b   :  { %v237_v40 = vsel %vm236_vm1, %v234_v39, 0.0 }
 0x19c   :  { %238 = vadd.xlane.f32.xlu0 %v237_v40 }
 0x1a0   :  { %241 = vadd.xlane.f32.xlu0 %v240_v42 }
 0x225   :  { %v239_v44 = vpop.xlane.xlu0 %238 }
 0x226   :  { %v250_v45 = vadd.f32 %v264_v43, %v239_v44 }
 0x228   :  { %253 = vst.msk [vmem:[%s469_s7] sm:$0xff] %vm252_vm2, %v250_v45 }
 0x229   :  { %v242_v46 = vpop.xlane.xlu0 %241 }
 0x22a   :  { %v251_v47 = vadd.f32 %v264_v43, %v242_v46 }
 0x22c   :  { %254 = vst.msk [vmem:[%s469_s7 + $0x8] sm:$0xff] %vm252_vm2, %v251_v47 }

</bundles_post_ra>
